<compile_context>
chip_gen: v7x
topology: tpu7x:2x2x1
jax: 0.10.0
libtpu: 0.0.40
codegen_flags: <defaults>
</compile_context>

<pallas_src>
import functools

import jax
import jax.numpy as jnp
from jax.experimental import pallas as pl
from jax.experimental.pallas import tpu as pltpu

LEAKY_SLOPE = 0.01          # PyTorch nn.LeakyReLU default negative_slope
LANE = 128                  # TPU lane width
NEG_BIG = -1.0e30           # bias for padded logit columns -> exp underflows to 0


def _round_up(x, m):
    return (x + m - 1) // m * m


def actor_kernel(x_ref, w1_ref, b1_ref, w2_ref, b2_ref, w3_ref, b3_ref, o_ref,
                 *, action_dim):
    x = x_ref[...]  # (TILE_B, obs_dim) float32

    # Layer 1: Linear + LeakyReLU (hidden padded to 128 lanes; pads stay 0)
    h = jnp.dot(x, w1_ref[...], preferred_element_type=jnp.float32) + b1_ref[...]
    h = jnp.where(h > 0, h, LEAKY_SLOPE * h)

    # Layer 2: Linear + LeakyReLU
    h = jnp.dot(h, w2_ref[...], preferred_element_type=jnp.float32) + b2_ref[...]
    h = jnp.where(h > 0, h, LEAKY_SLOPE * h)

    # Output layer: Linear. Padded action columns carry b3 = NEG_BIG so that
    # exp(logit - max) is exactly 0 for them -> softmax identical to unpadded.
    logits = jnp.dot(h, w3_ref[...], preferred_element_type=jnp.float32) + b3_ref[...]

    # Numerically stable softmax over the (padded, 128-lane) last dim in vregs.
    m = jnp.max(logits, axis=-1, keepdims=True)
    e = jnp.exp(logits - m)
    denom = jnp.sum(e, axis=-1, keepdims=True)
    r = pl.reciprocal(denom, approx=True)     # EUP slot (otherwise idle here)
    r = r * (2.0 - denom * r)                 # one Newton step -> full f32 precision
    probs = e * r

    # Store only the real action columns (masked vst in VMEM, hidden under DMA;
    # the HBM write is now 32 B/row instead of 512 B/row).
    o_ref[...] = probs[:, :action_dim].astype(o_ref.dtype)


def pad_params(params):
    """Pad weights/biases once (outside the per-step forward)."""
    w1, b1, w2, b2, w3, b3 = (params[k] for k in ("w1", "b1", "w2", "b2", "w3", "b3"))
    hidden = w1.shape[1]
    action_dim = w3.shape[1]
    h_pad = _round_up(hidden, LANE)
    a_pad = _round_up(action_dim, LANE)
    padded = {
        "w1": jnp.pad(w1, ((0, 0), (0, h_pad - hidden))),
        "b1": jnp.pad(b1, ((0, 0), (0, h_pad - hidden))),
        "w2": jnp.pad(w2, ((0, h_pad - hidden), (0, h_pad - hidden))),
        "b2": jnp.pad(b2, ((0, 0), (0, h_pad - hidden))),
        "w3": jnp.pad(w3, ((0, h_pad - hidden), (0, a_pad - action_dim))),
        # mask padded logit columns so softmax over 128 lanes == softmax over real cols
        "b3": jnp.pad(b3, ((0, 0), (0, a_pad - action_dim)), constant_values=NEG_BIG),
    }
    return padded, action_dim


def actor_forward(x, padded_params, action_dim, *, max_tile_b=8192):
    """x: (B, obs_dim) float32. padded_params: output of pad_params."""
    p = padded_params
    B, obs_dim = x.shape

    # Batch tile: large enough to amortize per-grid-step overhead, multiple of 8
    # sublanes. ~14 MiB VMEM at 8192 rows -> fits default scoped VMEM on v5e/v6e/v7x.
    tile_b = min(max_tile_b, _round_up(B, 8))
    grid = (pl.cdiv(B, tile_b),)   # partial last block handled by Pallas (row-wise ops)

    const = lambda a: pl.BlockSpec(a.shape, lambda i: (0,) * a.ndim)  # DMA'd once

    kernel = functools.partial(actor_kernel, action_dim=action_dim)

    return pl.pallas_call(
        kernel,
        out_shape=jax.ShapeDtypeStruct((B, action_dim), jnp.float32),
        grid=grid,
        in_specs=[
            pl.BlockSpec((tile_b, obs_dim), lambda i: (i, 0)),  # x tile, pipelined
            const(p["w1"]), const(p["b1"]),
            const(p["w2"]), const(p["b2"]),
            const(p["w3"]), const(p["b3"]),
        ],
        # last dim == full array dim (action_dim), so this BlockSpec is legal.
        out_specs=pl.BlockSpec((tile_b, action_dim), lambda i: (i, 0)),
        compiler_params=pltpu.CompilerParams(
            # batch tiles are independent -> shard across TCs where supported
            dimension_semantics=("parallel",),
            # no vmem_limit override: kernel needs only a few MiB; never claim
            # all of v7x's 64 MiB physical VMEM.
        ),
    )(x, p["w1"], p["b1"], p["w2"], p["b2"], p["w3"], p["b3"])


def init_params(key, obs_dim, action_dim, hidden=(64, 64)):
    """Deterministic init mimicking nn.Linear default (uniform(-1/sqrt(in), 1/sqrt(in)))."""
    dims = [obs_dim] + list(hidden) + [action_dim]
    params = {}
    for i in range(3):
        in_d, out_d = dims[i], dims[i + 1]
        key, kw, kb = jax.random.split(key, 3)
        bound = 1.0 / jnp.sqrt(jnp.float32(in_d))
        params[f"w{i+1}"] = jax.random.uniform(
            kw, (in_d, out_d), jnp.float32, -bound, bound)
        params[f"b{i+1}"] = jax.random.uniform(
            kb, (1, out_d), jnp.float32, -bound, bound)
    return params


def actor_ref(x, params):
    """Pure-JAX reference for sanity checking."""
    h = x @ params["w1"] + params["b1"]
    h = jnp.where(h > 0, h, LEAKY_SLOPE * h)
    h = h @ params["w2"] + params["b2"]
    h = jnp.where(h > 0, h, LEAKY_SLOPE * h)
    logits = h @ params["w3"] + params["b3"]
    return jax.nn.softmax(logits, axis=-1)


if __name__ == "__main__":
    key = jax.random.PRNGKey(0)
    batch, obs_dim, action_dim = 2, 16, 8

    key, kx, kp = jax.random.split(key, 3)
    x = jax.random.normal(kx, (batch, obs_dim), jnp.float32)
    params = init_params(kp, obs_dim, action_dim, hidden=(64, 64))
    padded, a_dim = pad_params(params)   # done once, outside the forward

    out = actor_forward(x, padded, a_dim)
    out = jax.block_until_ready(out)

    ref = actor_ref(x, params)
    assert out.shape == (batch, action_dim)
    assert jnp.allclose(out, ref, atol=1e-5, rtol=1e-5)
    assert jnp.allclose(jnp.sum(out, axis=-1), 1.0, atol=1e-5)

    # Exercise multi-tile grid + partial last block (small shapes, cheap).
    key, kx2 = jax.random.split(key)
    x2 = jax.random.normal(kx2, (37, obs_dim), jnp.float32)
    out2 = jax.block_until_ready(actor_forward(x2, padded, a_dim, max_tile_b=16))
    assert out2.shape == (37, action_dim)
    assert jnp.allclose(out2, actor_ref(x2, params), atol=1e-5, rtol=1e-5)

    print("KERNEL_OK")
</pallas_src>

<mosaic_0001>
module attributes {stable_mosaic.version = 11 : i64} {
  func.func @actor_kernel(%arg0: i32, %arg1: memref<8x16xf32, #tpu.memory_space<vmem>>, %arg2: memref<16x128xf32, #tpu.memory_space<vmem>>, %arg3: memref<1x128xf32, #tpu.memory_space<vmem>>, %arg4: memref<128x128xf32, #tpu.memory_space<vmem>>, %arg5: memref<1x128xf32, #tpu.memory_space<vmem>>, %arg6: memref<128x128xf32, #tpu.memory_space<vmem>>, %arg7: memref<1x128xf32, #tpu.memory_space<vmem>>, %arg8: memref<8x8xf32, #tpu.memory_space<vmem>>) attributes {dimension_semantics = [#tpu.dimension_semantics<parallel>], iteration_bounds = array<i64: 1>, scalar_prefetch = 0 : i64, scratch_operands = 0 : i64, tpu.core_type = #tpu.core_type<tc>, window_params = [{transform_indices = @transform_0, window_bounds = array<i64: 8, 16>}, {pipeline_mode = #tpu.pipeline_mode<synchronous>, transform_indices = @transform_1, window_bounds = array<i64: 16, 128>}, {pipeline_mode = #tpu.pipeline_mode<synchronous>, transform_indices = @transform_2, window_bounds = array<i64: 1, 128>}, {pipeline_mode = #tpu.pipeline_mode<synchronous>, transform_indices = @transform_3, window_bounds = array<i64: 128, 128>}, {pipeline_mode = #tpu.pipeline_mode<synchronous>, transform_indices = @transform_4, window_bounds = array<i64: 1, 128>}, {pipeline_mode = #tpu.pipeline_mode<synchronous>, transform_indices = @transform_5, window_bounds = array<i64: 128, 128>}, {pipeline_mode = #tpu.pipeline_mode<synchronous>, transform_indices = @transform_6, window_bounds = array<i64: 1, 128>}, {transform_indices = @transform_7, window_bounds = array<i64: 8, 8>}]} {
    %c0 = arith.constant 0 : index
    %c0_0 = arith.constant 0 : index
    %0 = vector.load %arg1[%c0, %c0_0] : memref<8x16xf32, #tpu.memory_space<vmem>>, vector<8x16xf32>
    %c0_1 = arith.constant 0 : index
    %c0_2 = arith.constant 0 : index
    %1 = vector.load %arg2[%c0_1, %c0_2] : memref<16x128xf32, #tpu.memory_space<vmem>>, vector<16x128xf32>
    %cst = arith.constant dense<0.000000e+00> : vector<8x128xf32>
    %2 = tpu.matmul %0, %1, %cst {dimension_numbers = #tpu.dot_dimension_numbers<[1], [0], [0], [1], [0, 0, 1, 1], [], []>} : vector<8x16xf32>, vector<16x128xf32>, vector<8x128xf32> -> vector<8x128xf32>
    %c0_3 = arith.constant 0 : index
    %c0_4 = arith.constant 0 : index
    %3 = vector.load %arg3[%c0_3, %c0_4] : memref<1x128xf32, #tpu.memory_space<vmem>>, vector<1x128xf32>
    %4 = vector.broadcast %3 : vector<1x128xf32> to vector<8x128xf32>
    %5 = arith.addf %2, %4 : vector<8x128xf32>
    %cst_5 = arith.constant 0.000000e+00 : f32
    %6 = vector.broadcast %cst_5 : f32 to vector<8x128xf32>
    %7 = arith.cmpf ogt, %5, %6 : vector<8x128xf32>
    %cst_6 = arith.constant 0.00999999977 : f32
    %8 = vector.broadcast %cst_6 : f32 to vector<8x128xf32>
    %9 = arith.mulf %8, %5 : vector<8x128xf32>
    %10 = arith.select %7, %5, %9 : vector<8x128xi1>, vector<8x128xf32>
    %c0_7 = arith.constant 0 : index
    %c0_8 = arith.constant 0 : index
    %11 = vector.load %arg4[%c0_7, %c0_8] : memref<128x128xf32, #tpu.memory_space<vmem>>, vector<128x128xf32>
    %cst_9 = arith.constant dense<0.000000e+00> : vector<8x128xf32>
    %12 = tpu.matmul %10, %11, %cst_9 {dimension_numbers = #tpu.dot_dimension_numbers<[1], [0], [0], [1], [0, 0, 1, 1], [], []>} : vector<8x128xf32>, vector<128x128xf32>, vector<8x128xf32> -> vector<8x128xf32>
    %c0_10 = arith.constant 0 : index
    %c0_11 = arith.constant 0 : index
    %13 = vector.load %arg5[%c0_10, %c0_11] : memref<1x128xf32, #tpu.memory_space<vmem>>, vector<1x128xf32>
    %14 = vector.broadcast %13 : vector<1x128xf32> to vector<8x128xf32>
    %15 = arith.addf %12, %14 : vector<8x128xf32>
    %cst_12 = arith.constant 0.000000e+00 : f32
    %16 = vector.broadcast %cst_12 : f32 to vector<8x128xf32>
    %17 = arith.cmpf ogt, %15, %16 : vector<8x128xf32>
    %cst_13 = arith.constant 0.00999999977 : f32
    %18 = vector.broadcast %cst_13 : f32 to vector<8x128xf32>
    %19 = arith.mulf %18, %15 : vector<8x128xf32>
    %20 = arith.select %17, %15, %19 : vector<8x128xi1>, vector<8x128xf32>
    %c0_14 = arith.constant 0 : index
    %c0_15 = arith.constant 0 : index
    %21 = vector.load %arg6[%c0_14, %c0_15] : memref<128x128xf32, #tpu.memory_space<vmem>>, vector<128x128xf32>
    %cst_16 = arith.constant dense<0.000000e+00> : vector<8x128xf32>
    %22 = tpu.matmul %20, %21, %cst_16 {dimension_numbers = #tpu.dot_dimension_numbers<[1], [0], [0], [1], [0, 0, 1, 1], [], []>} : vector<8x128xf32>, vector<128x128xf32>, vector<8x128xf32> -> vector<8x128xf32>
    %c0_17 = arith.constant 0 : index
    %c0_18 = arith.constant 0 : index
    %23 = vector.load %arg7[%c0_17, %c0_18] : memref<1x128xf32, #tpu.memory_space<vmem>>, vector<1x128xf32>
    %24 = vector.broadcast %23 : vector<1x128xf32> to vector<8x128xf32>
    %25 = arith.addf %22, %24 : vector<8x128xf32>
    %cst_19 = arith.constant dense<0xFF800000> : vector<8xf32>
    %26 = vector.multi_reduction <maximumf>, %25, %cst_19 [1] : vector<8x128xf32> to vector<8xf32>
    %27 = vector.shape_cast %26 : vector<8xf32> to vector<8x1xf32>
    %28 = vector.broadcast %27 : vector<8x1xf32> to vector<8x128xf32>
    %29 = arith.subf %25, %28 : vector<8x128xf32>
    %30 = math.exp %29 : vector<8x128xf32>
    %cst_20 = arith.constant dense<0.000000e+00> : vector<8xf32>
    %31 = vector.multi_reduction <add>, %30, %cst_20 [1] : vector<8x128xf32> to vector<8xf32>
    %32 = vector.shape_cast %31 : vector<8xf32> to vector<8x1xf32>
    %33 = tpu.reciprocal %32 {approx = true} : vector<8x1xf32> -> vector<8x1xf32>
    %34 = arith.mulf %32, %33 : vector<8x1xf32>
    %cst_21 = arith.constant 2.000000e+00 : f32
    %35 = vector.broadcast %cst_21 : f32 to vector<8x1xf32>
    %36 = arith.subf %35, %34 : vector<8x1xf32>
    %37 = arith.mulf %33, %36 : vector<8x1xf32>
    %38 = vector.broadcast %37 : vector<8x1xf32> to vector<8x128xf32>
    %39 = arith.mulf %30, %38 : vector<8x128xf32>
    %40 = vector.extract_strided_slice %39 {offsets = [0, 0], sizes = [8, 8], strides = [1, 1]} : vector<8x128xf32> to vector<8x8xf32>
    %c0_22 = arith.constant 0 : index
    %c0_23 = arith.constant 0 : index
    %41 = vector.load %arg8[%c0_22, %c0_23] : memref<8x8xf32, #tpu.memory_space<vmem>>, vector<8x8xf32>
    tpu.vector_store %arg8[%c0_22, %c0_23], %40 {strides = array<i32>} : memref<8x8xf32, #tpu.memory_space<vmem>>, vector<8x8xf32>,
    return
  }
  func.func @transform_0(%arg0: i32) -> (i32, i32) {
    %c0_i32 = arith.constant 0 : i32
    %c0_i32_0 = arith.constant 0 : i32
    return %arg0, %c0_i32 : i32, i32
  }
  func.func @transform_1(%arg0: i32) -> (i32, i32) {
    %c0_i32 = arith.constant 0 : i32
    %c0_i32_0 = arith.constant 0 : i32
    %c0_i32_1 = arith.constant 0 : i32
    return %c0_i32, %c0_i32_0 : i32, i32
  }
  func.func @transform_2(%arg0: i32) -> (i32, i32) {
    %c0_i32 = arith.constant 0 : i32
    %c0_i32_0 = arith.constant 0 : i32
    %c0_i32_1 = arith.constant 0 : i32
    return %c0_i32, %c0_i32_0 : i32, i32
  }
  func.func @transform_3(%arg0: i32) -> (i32, i32) {
    %c0_i32 = arith.constant 0 : i32
    %c0_i32_0 = arith.constant 0 : i32
    %c0_i32_1 = arith.constant 0 : i32
    return %c0_i32, %c0_i32_0 : i32, i32
  }
  func.func @transform_4(%arg0: i32) -> (i32, i32) {
    %c0_i32 = arith.constant 0 : i32
    %c0_i32_0 = arith.constant 0 : i32
    %c0_i32_1 = arith.constant 0 : i32
    return %c0_i32, %c0_i32_0 : i32, i32
  }
  func.func @transform_5(%arg0: i32) -> (i32, i32) {
    %c0_i32 = arith.constant 0 : i32
    %c0_i32_0 = arith.constant 0 : i32
    %c0_i32_1 = arith.constant 0 : i32
    return %c0_i32, %c0_i32_0 : i32, i32
  }
  func.func @transform_6(%arg0: i32) -> (i32, i32) {
    %c0_i32 = arith.constant 0 : i32
    %c0_i32_0 = arith.constant 0 : i32
    %c0_i32_1 = arith.constant 0 : i32
    return %c0_i32, %c0_i32_0 : i32, i32
  }
  func.func @transform_7(%arg0: i32) -> (i32, i32) {
    %c0_i32 = arith.constant 0 : i32
    %c0_i32_0 = arith.constant 0 : i32
    return %arg0, %c0_i32 : i32, i32
  }
}

</mosaic_0001>

<bundles_post_ra>
// kernel: tpu_custom_call.1
= control target key start
LH: loop header
LB: loop body
LE: loop exit
PB: predicated region body
PF: predicated region fallthrough
CT: control target
= control target key end

     0   :  { %12 = vsyncpa [#allocation3], 0  ;;  %s857_s0 = inlined_call_operand.hbm [shape: f32[2,16], index: 0, kind: input, shape index: {}]   ;;  %s858_s1 = inlined_call_operand.hbm [shape: f32[16,128], index: 1, kind: input, shape index: {}]   ;;  %s859_s2 = inlined_call_operand.vmem [shape: f32[1,128], index: 2, kind: input, shape index: {}]   ;;  %s860_s3 = inlined_call_operand.hbm [shape: f32[128,128], index: 3, kind: input, shape index: {}]   ;;  %s861_s4 = inlined_call_operand.vmem [shape: f32[1,128], index: 4, kind: input, shape index: {}]   ;;  %s862_s5 = inlined_call_operand.hbm [shape: f32[128,128], index: 5, kind: input, shape index: {}]   ;;  %s863_s6 = inlined_call_operand.vmem [shape: f32[1,128], index: 6, kind: input, shape index: {}]   ;;  %s864_s7 = inlined_call_operand.hbm [shape: f32[2,8], index: 7, kind: output, shape index: {}]  }
   0x1   :  { %13 = vsyncpa [#allocation6], 0 }
   0x2   :  { %14 = vsyncpa [#allocation9], 0 }
   0x3   :  { %15 = vsyncpa [#allocation4], 0 }
   0x4   :  { %20 = vsyncadd [#allocation3], 96  ;;  %s694_s24 = smov [#allocation5]   ;;  %s576_s28 = scalar_lea.hbm %s858_s1, 256 }
   0x5   :  { %s33_s25 = sshll.u32 %s694_s24, 4  ;;  %p577_p0 = scmp.ne.s32.totalorder %s858_s1, %s576_s28  ;;  %s34_s25 = int_to_ptr.vmem [resolvable:$true] %s33_s25 }
   0x6   :  { %p580_p1 = scmp.lt.u32.totalorder %s576_s28, %s858_s1 }
   0x8   :  { %p582_p2 = pnand %p580_p1, %p577_p0 }
   0xa   :  { %585 = shalt.err (!%p582_p2)
}
   0xb   :  { %s586_s10 = scalar_lea.vmem %s34_s25, 256  ;;  %p591_p4 = scmp.lt.s32.totalorder %s34_s25, %s34_s25 }
   0xc   :  { %p587_p3 = scmp.ne.s32.totalorder %s34_s25, %s586_s10  ;;  %p592_p5 = scmp.lt.s32.totalorder %s586_s10, %s586_s10 }
   0xe   :  { %p593_p6 = por %p592_p5, %p591_p4 }
  0x10   :  { %p594_p7 = pnand %p593_p6, %p587_p3 }
  0x12   :  { %597 = shalt.err (!%p594_p7)
}
  0x13   :  { %s695_s11 = smov 128   ;;  %s696_s12 = smov 8  }
  0x14   :  { %39 = dma.hbm_to_vmem [thread:$0]  %s858_s1, 256, %s34_s25, [#allocation6], %s695_s11, %s695_s11, %s696_s12  }
  0x15   :  { %s697_s15 = smov [#allocation2]   ;;  %s598_s19 = scalar_lea.hbm %s857_s0, 32 }
  0x16   :  { %s21_s16 = sshll.u32 %s697_s15, 4  ;;  %p599_p8 = scmp.ne.s32.totalorder %s857_s0, %s598_s19  ;;  %s22_s16 = int_to_ptr.vmem [resolvable:$true] %s21_s16 }
  0x17   :  { %p602_p9 = scmp.lt.u32.totalorder %s598_s19, %s857_s0 }
  0x19   :  { %p604_p10 = pnand %p602_p9, %p599_p8 }
  0x1b   :  { %607 = shalt.err (!%p604_p10)
}
  0x1c   :  { %s608_s24 = scalar_lea.vmem %s22_s16, 32  ;;  %s612_s1 = scalar_lea.vmem %s22_s16, 128 }
  0x1d   :  { %p609_p11 = scmp.ne.s32.totalorder %s22_s16, %s608_s24  ;;  %p613_p12 = scmp.lt.s32.totalorder %s22_s16, %s22_s16 }
  0x1e   :  { %p614_p13 = scmp.lt.s32.totalorder %s612_s1, %s608_s24 }
  0x20   :  { %p615_p0 = por %p614_p13, %p613_p12 }
  0x22   :  { %p616_p1 = pnand %p615_p0, %p609_p11 }
  0x24   :  { %619 = shalt.err (!%p616_p1)
}
  0x25   :  { %s698_s25 = smov 32   ;;  %s699_s26 = smov 2  }
  0x26   :  { %27 = dma.hbm_to_vmem [thread:$0]  %s857_s0, 32, %s22_s16, [#allocation3], %s698_s25, %s698_s25, %s699_s26  }
  0x27   :  { %s700_s29 = smov [#allocation7]   ;;  %s701_s8 = smov [#allocation8]  }
  0x28   :  { %s47_s30 = sshll.u32 %s700_s29, 4  ;;  %s61_s9 = sshll.u32 %s701_s8, 4  ;;  %s48_s30 = int_to_ptr.vmem [resolvable:$true] %s47_s30  ;;  %s776_s9 = int_to_ptr.vmem [resolvable:$true] %s61_s9 }
  0x29   :  { %s620_s14 = scalar_lea.hbm %s860_s3, 2048 }
  0x2a   :  { %p621_p2 = scmp.ne.s32.totalorder %s860_s3, %s620_s14  ;;  %p624_p3 = scmp.lt.u32.totalorder %s620_s14, %s860_s3 }
  0x2c   :  { %p626_p4 = pnand %p624_p3, %p621_p2 }
  0x2e   :  { %629 = shalt.err (!%p626_p4)
}
  0x2f   :  { %s630_s0 = scalar_lea.vmem %s48_s30, 2048  ;;  %p635_p6 = scmp.lt.s32.totalorder %s48_s30, %s48_s30 }
  0x30   :  { %p631_p5 = scmp.ne.s32.totalorder %s48_s30, %s630_s0  ;;  %p636_p7 = scmp.lt.s32.totalorder %s630_s0, %s630_s0 }
  0x32   :  { %p637_p8 = por %p636_p7, %p635_p6 }
  0x34   :  { %p638_p9 = pnand %p637_p8, %p631_p5 }
  0x36   :  { %641 = shalt.err (!%p638_p9)
}
  0x37   :  { %53 = dma.hbm_to_vmem [thread:$0]  %s860_s3, 2048, %s48_s30, [#allocation6], %s695_s11, %s695_s11, %s696_s12  }
  0x38   :  { %s642_s23 = scalar_lea.hbm %s862_s5, 2048 }
  0x39   :  { %p643_p10 = scmp.ne.s32.totalorder %s862_s5, %s642_s23  ;;  %p646_p11 = scmp.lt.u32.totalorder %s642_s23, %s862_s5 }
  0x3b   :  { %p648_p12 = pnand %p646_p11, %p643_p10 }
  0x3d   :  { %651 = shalt.err (!%p648_p12)
}
  0x3e   :  { %s652_s29 = scalar_lea.vmem %s776_s9, 2048  ;;  %p657_p0 = scmp.lt.s32.totalorder %s776_s9, %s776_s9 }
  0x3f   :  { %p653_p13 = scmp.ne.s32.totalorder %s776_s9, %s652_s29  ;;  %p658_p1 = scmp.lt.s32.totalorder %s652_s29, %s652_s29 }
  0x41   :  { %p659_p2 = por %p658_p1, %p657_p0 }
  0x43   :  { %p660_p3 = pnand %p659_p2, %p653_p13 }
  0x45   :  { %663 = shalt.err (!%p660_p3)
}
  0x46   :  { %67 = dma.hbm_to_vmem [thread:$0]  %s862_s5, 2048, %s776_s9, [#allocation9], %s695_s11, %s695_s11, %s696_s12  }
  0x47   :  { %686 = dma.done.wait [#allocation3], 128  }
  0x48   :  { %687 = vsyncadd [#allocation3], 4294967168 }
  0x49   :  { %688 = dma.done.wait [#allocation6], 2304  }
  0x4a   :  { %689 = vsyncadd [#allocation6], 4294964992 }
  0x4b   :  { %690 = dma.done.wait [#allocation9], 2048  }
  0x4c   :  { %691 = vsyncadd [#allocation9], 4294965248  ;;  %v702_v0 = vmov 0.0|0.0   ;;  %vm703_vm0 = vmmov 0   ;;  %v704_v1 = vmov 0.0   ;;  %v83_v2 = vld [vmem:[#allocation5] sm:$0xff] }
  0x4d   :  { %509 = vmatprep.subr.bf16.mxu0 %v702_v0  ;;  %436 = vmatprep.mubr.msk.f32.mxu0 %vm703_vm0, %v704_v1  ;;  %v84_v3 = vld [vmem:[#allocation5 + $0x8] sm:$0xff]  ;;  %v169_v5 = vld [vmem:[#allocation7] sm:$0xff]  ;;  %v170_v6 = vld [vmem:[#allocation7 + $0x8] sm:$0xff]  ;;  %vm92_vm1 = vcmask 130048   ;;  %vm370_vm4 = vcmask 64512  }
  0x4e   :  { %512 = vmatprep.subr.bf16.mxu1 %v702_v0  ;;  %471 = vmatprep.mubr.msk.f32.mxu1 %vm703_vm0, %v704_v1  ;;  %v510_v4 = vpack.c.bf16 %v84_v3, %v83_v2  ;;  %v171_v7 = vld [vmem:[#allocation7 + $0x10] sm:$0xff]  ;;  %v513_v8 = vpack.c.bf16 %v170_v6, %v169_v5  ;;  %v172_v9 = vld [vmem:[#allocation7 + $0x18] sm:$0xff]  ;;  %v82_v10 = vld [vmem:[#allocation2] sm:$0xff] }
  0x4f   :  { %v516_v11 = vpack.c.bf16 %v172_v9, %v171_v7  ;;  %v173_v12 = vld [vmem:[#allocation7 + $0x20] sm:$0xff]  ;;  %v174_v13 = vld [vmem:[#allocation7 + $0x28] sm:$0xff]  ;;  %v175_v15 = vld [vmem:[#allocation7 + $0x30] sm:$0xff] }
  0x50   :  { %511 = vmatpush3.bf16.msra.mxu0 %v510_v4  ;;  %514 = vmatpush3.bf16.msra.mxu1 %v513_v8  ;;  %v519_v14 = vpack.c.bf16 %v174_v13, %v173_v12  ;;  %v176_v16 = vld [vmem:[#allocation7 + $0x38] sm:$0xff]  ;;  %v177_v18 = vld [vmem:[#allocation7 + $0x40] sm:$0xff]  ;;  %v178_v19 = vld [vmem:[#allocation7 + $0x48] sm:$0xff] }
  0x51   :  { %536 = vmatprep.subr.bf16.mxu0 %v702_v0  ;;  %515 = vmatprep.subr.bf16.mxu1 %v702_v0  ;;  %v522_v17 = vpack.c.bf16 %v176_v16, %v175_v15  ;;  %v525_v20 = vpack.c.bf16 %v178_v19, %v177_v18  ;;  %v179_v21 = vld [vmem:[#allocation7 + $0x50] sm:$0xff]  ;;  %v180_v22 = vld [vmem:[#allocation7 + $0x58] sm:$0xff]  ;;  %v181_v24 = vld [vmem:[#allocation7 + $0x60] sm:$0xff] }
  0x52   :  { %v528_v23 = vpack.c.bf16 %v180_v22, %v179_v21  ;;  %v182_v25 = vld [vmem:[#allocation7 + $0x68] sm:$0xff]  ;;  %v183_v27 = vld [vmem:[#allocation7 + $0x70] sm:$0xff]  ;;  %v184_v28 = vld [vmem:[#allocation7 + $0x78] sm:$0xff] }
  0x53   :  { %437 = vmatmul.mubr.msk.f32.vlgmr.msra.gmra.mrb[0].mxu0 %vm92_vm1, %v82_v10  ;;  %v531_v26 = vpack.c.bf16 %v182_v25, %v181_v24  ;;  %v534_v29 = vpack.c.bf16 %v184_v28, %v183_v27  ;;  %v265_v30 = vld [vmem:[#allocation8] sm:$0xff]  ;;  %v266_v31 = vld [vmem:[#allocation8 + $0x8] sm:$0xff]  ;;  %v267_v32 = vld [vmem:[#allocation8 + $0x10] sm:$0xff] }
  0x54   :  { %506 = vmatprep.mubr.msk.f32.mxu0 %vm703_vm0, %v704_v1  ;;  %517 = vmatpush3.bf16.msra.mxu1 %v516_v11  ;;  %v537_v33 = vpack.c.bf16 %v266_v31, %v265_v30  ;;  %v268_v34 = vld [vmem:[#allocation8 + $0x18] sm:$0xff]  ;;  %v269_v36 = vld [vmem:[#allocation8 + $0x20] sm:$0xff]  ;;  %v270_v37 = vld [vmem:[#allocation8 + $0x28] sm:$0xff] }
  0x55   :  { %518 = vmatprep.subr.bf16.mxu1 %v702_v0  ;;  %v540_v35 = vpack.c.bf16 %v268_v34, %v267_v32  ;;  %v543_v38 = vpack.c.bf16 %v270_v37, %v269_v36  ;;  %v271_v39 = vld [vmem:[#allocation8 + $0x30] sm:$0xff]  ;;  %v272_v40 = vld [vmem:[#allocation8 + $0x38] sm:$0xff]  ;;  %v273_v42 = vld [vmem:[#allocation8 + $0x40] sm:$0xff] }
  0x56   :  { %538 = vmatpush3.bf16.msra.mxu0 %v537_v33  ;;  %v546_v41 = vpack.c.bf16 %v272_v40, %v271_v39  ;;  %v274_v43 = vld [vmem:[#allocation8 + $0x48] sm:$0xff]  ;;  %v275_v45 = vld [vmem:[#allocation8 + $0x50] sm:$0xff]  ;;  %v276_v46 = vld [vmem:[#allocation8 + $0x58] sm:$0xff] }
  0x57   :  { %539 = vmatprep.subr.bf16.mxu0 %v702_v0  ;;  %v549_v44 = vpack.c.bf16 %v274_v43, %v273_v42  ;;  %v552_v47 = vpack.c.bf16 %v276_v46, %v275_v45  ;;  %v277_v48 = vld [vmem:[#allocation8 + $0x60] sm:$0xff]  ;;  %v278_v49 = vld [vmem:[#allocation8 + $0x68] sm:$0xff]  ;;  %v279_v57 = vld [vmem:[#allocation8 + $0x70] sm:$0xff] }
  0x58   :  { %520 = vmatpush3.bf16.msra.mxu1 %v519_v14  ;;  %v555_v50 = vpack.c.bf16 %v278_v49, %v277_v48  ;;  %v391_v51 = vld [vmem:[%s859_s2] ss:$0 sm:$0xff]  ;;  %v280_v58 = vld [vmem:[#allocation8 + $0x78] sm:$0xff] }
  0x59   :  { %521 = vmatprep.subr.bf16.mxu1 %v702_v0  ;;  %v558_v59 = vpack.c.bf16 %v280_v58, %v279_v57  ;;  %v393_v60 = vld [vmem:[%s861_s4] ss:$0 sm:$0xff] }
  0x5a   :  { %541 = vmatpush3.bf16.msra.mxu0 %v540_v35  ;;  %v394_v2 = vld [vmem:[%s863_s6] ss:$0 sm:$0xff] }
  0x5b   :  { %542 = vmatprep.subr.bf16.mxu0 %v702_v0 }
  0x5c   :  { %523 = vmatpush3.bf16.msra.mxu1 %v522_v17 }
  0x5d   :  { %524 = vmatprep.subr.bf16.mxu1 %v702_v0 }
  0x5e   :  { %544 = vmatpush3.bf16.msra.mxu0 %v543_v38 }
  0x5f   :  { %545 = vmatprep.subr.bf16.mxu0 %v702_v0 }
  0x60   :  { %526 = vmatpush3.bf16.msra.mxu1 %v525_v20 }
  0x61   :  { %527 = vmatprep.subr.bf16.mxu1 %v702_v0 }
  0x62   :  { %547 = vmatpush3.bf16.msra.mxu0 %v546_v41 }
  0x63   :  { %548 = vmatprep.subr.bf16.mxu0 %v702_v0 }
  0x64   :  { %529 = vmatpush3.bf16.msra.mxu1 %v528_v23 }
  0x65   :  { %530 = vmatprep.subr.bf16.mxu1 %v702_v0 }
  0x66   :  { %550 = vmatpush3.bf16.msra.mxu0 %v549_v44 }
  0x67   :  { %551 = vmatprep.subr.bf16.mxu0 %v702_v0 }
  0x68   :  { %532 = vmatpush3.bf16.msra.mxu1 %v531_v26 }
  0x69   :  { %533 = vmatprep.subr.bf16.mxu1 %v702_v0 }
  0x6a   :  { %553 = vmatpush3.bf16.msra.mxu0 %v552_v47 }
  0x6b   :  { %554 = vmatprep.subr.bf16.mxu0 %v702_v0 }
  0x6c   :  { %535 = vmatpush3.bf16.msra.mxu1 %v534_v29 }
  0x6e   :  { %556 = vmatpush3.bf16.msra.mxu0 %v555_v50 }
  0x6f   :  { %557 = vmatprep.subr.bf16.mxu0 %v702_v0 }
  0x72   :  { %559 = vmatpush3.bf16.msra.mxu0 %v558_v59 }
 0x126   :  { %v162_v52 = vpop.f32.mrb[0].mxu0 }
 0x127   :  { %v163_v53 = vadd.f32 %v391_v51, %v162_v52  ;;  %v438_v54 = vpop.f32.mrb[1].mxu0 }
 0x129   :  { %v167_v55 = vmul.f32 0.01, %v163_v53  ;;  %vm166_vm2 = vcmp.gt.f32.partialorder %v163_v53, 0.0 }
 0x12b   :  { %v168_v56 = vsel %vm166_vm2, %v163_v53, %v167_v55 }
 0x12c   :  { %472 = vmatmul.mubr.f32.vlgmr.msra.gmra.mrb[0].mxu1 %v168_v56 }
 0x1ff   :  { %v258_v61 = vpop.f32.mrb[0].mxu1 }
 0x200   :  { %v259_v62 = vadd.f32 %v393_v60, %v258_v61  ;;  %v473_v63 = vpop.f32.mrb[1].mxu1 }
 0x202   :  { %vm262_vm3 = vcmp.gt.f32.partialorder %v259_v62, 0.0  ;;  %v263_v0 = vmul.f32 0.01, %v259_v62 }
 0x204   :  { %v264_v1 = vsel %vm262_vm3, %v259_v62, %v263_v0 }
 0x205   :  { %507 = vmatmul.mubr.f32.vlgmr.msra.gmra.mrb[2].mxu0 %v264_v1 }
 0x2d8   :  { %v354_v3 = vpop.f32.mrb[2].mxu0 }
 0x2d9   :  { %v355_v4 = vadd.f32 %v394_v2, %v354_v3  ;;  %v508_v5 = vpop.f32.mrb[3].mxu0 }
 0x2db   :  { %358 = vmax.xlane.f32.xlu0 %v355_v4 }
 0x368   :  { %v359_v6 = vpop.xlane.xlu0 %358 }
 0x369   :  { %v360_v7 = vsub.f32 %v355_v4, %v359_v6 }
 0x36b   :  { %v361_v8 = vmul.f32 1.442695, %v360_v7 }
 0x36d   :  { %572 = vpow2.f32 %v361_v8 }
 0x377   :  { %v573_v9 = vpop.eup %572 }
 0x378   :  { %363 = vadd.xlane.f32.xlu0 %v573_v9 }
 0x405   :  { %v364_v10 = vpop.xlane.xlu0 %363 }
 0x406   :  { %574 = vrcp.f32 %v364_v10 }
 0x410   :  { %v575_v11 = vpop.eup %574 }
 0x411   :  { %v366_v12 = vmul.f32 %v575_v11, %v364_v10 }
 0x413   :  { %v367_v13 = vsub.f32 2.0, %v366_v12 }
 0x415   :  { %v368_v14 = vmul.f32 %v575_v11, %v367_v13 }
 0x417   :  { %v369_v15 = vmul.f32 %v573_v9, %v368_v14 }
 0x419   :  { %371 = vst.msk [vmem:[#allocation10] sm:$0xff] %vm370_vm4, %v369_v15 }
 0x41a   :  { %376 = vsyncadd [#allocation4], 96  ;;  %s705_s4 = smov [#allocation10]  }
 0x41b   :  { %s377_s6 = sshll.u32 %s705_s4, 4  ;;  %s378_s6 = int_to_ptr.vmem [resolvable:$true] %s377_s6 }
 0x41c   :  { %s664_s10 = scalar_lea.vmem %s378_s6, 32  ;;  %s668_s13 = scalar_lea.vmem %s378_s6, 128 }
 0x41d   :  { %p665_p4 = scmp.ne.s32.totalorder %s378_s6, %s664_s10  ;;  %p669_p5 = scmp.lt.s32.totalorder %s378_s6, %s378_s6 }
 0x41e   :  { %p670_p6 = scmp.lt.s32.totalorder %s668_s13, %s664_s10 }
 0x420   :  { %p671_p7 = por %p670_p6, %p669_p5 }
 0x422   :  { %p672_p8 = pnand %p671_p7, %p665_p4 }
 0x424   :  { %675 = shalt.err (!%p672_p8)
}
 0x425   :  { %s676_s17 = scalar_lea.hbm %s864_s7, 32 }
 0x426   :  { %p677_p9 = scmp.ne.s32.totalorder %s864_s7, %s676_s17  ;;  %p680_p10 = scmp.lt.u32.totalorder %s676_s17, %s864_s7 }
 0x428   :  { %p682_p11 = pnand %p680_p10, %p677_p9 }
 0x42a   :  { %685 = shalt.err (!%p682_p11)
}
 0x42b   :  { %383 = dma.vmem_to_hbm [thread:$0]  %s378_s6, 32, %s864_s7, [#allocation4], %s698_s25, %s698_s25, %s699_s26  }
 0x42c   :  { %692 = dma.done.wait [#allocation4], 128  }
 0x42d   :  { %693 = vsyncadd [#allocation4], 4294967168 }
 0x42e   :  { %387 = vsyncpa [#allocation3], 1 }
 0x42f   :  { %388 = vsyncpa [#allocation6], 1 }
 0x430   :  { %389 = vsyncpa [#allocation9], 1 }
 0x431   :  { %390 = vsyncpa [#allocation4], 1 }

</bundles_post_ra>
